<compile_context>
chip_gen: v7x
topology: tpu7x:2x2x1
jax: 0.10.0
libtpu: 0.0.40
codegen_flags: <defaults>
</compile_context>

<pallas_src>
import jax
import jax.numpy as jnp
from jax.experimental import pallas as pl
from jax.experimental.pallas import tpu as pltpu

IN_DIM = 784          # 28 * 28
HID_DIM = 400         # logical hidden size (nn.Linear(784, 400))
HID_PAD = 512         # 400 padded up to a lane-friendly multiple of 128


def _round_up(n, m):
    return ((n + m - 1) // m) * m


def mnist_encoder_kernel(x_ref, w1_ref, b1_ref, w3_ref, b3_ref, out_ref):
    # fc1: (TB, 784) @ (784, 512) + (1, 512), then ReLU.  bf16 inputs,
    # f32 accumulation on the MXU.
    h = jnp.dot(x_ref[...], w1_ref[...], preferred_element_type=jnp.float32)
    h = jnp.maximum(h + b1_ref[...], 0.0)
    # fc3: (TB, 512) @ (512, OUT_PAD) + (1, OUT_PAD).  Padded hidden columns
    # and padded W3 rows are exact zeros, so the result is unchanged.
    z = jnp.dot(h.astype(w3_ref.dtype), w3_ref[...],
                preferred_element_type=jnp.float32)
    out_ref[...] = (z + b3_ref[...]).astype(out_ref.dtype)


def mnist_encoder(x_nchw, w1, b1, w3, b3, *, tile_b=256):
    """x_nchw: (B, 1, 28, 28) float32. Weights stored transposed:
       w1: (784, 400), b1: (1, 400), w3: (400, output_dim), b3: (1, output_dim).
       Returns (B, output_dim) float32."""
    B = x_nchw.shape[0]
    output_dim = w3.shape[1]
    out_pad = _round_up(max(output_dim, 128), 128)

    # Batch tile: at most tile_b, at least a sublane-aligned cover of B.
    tb = min(tile_b, _round_up(B, 8))
    b_pad = _round_up(B, tb)

    # Flatten exactly like torch's x.view(-1, 784) on contiguous NCHW,
    # cast to bf16, pad batch rows with zeros.
    x = x_nchw.reshape(B, IN_DIM).astype(jnp.bfloat16)
    if b_pad != B:
        x = jnp.pad(x, ((0, b_pad - B), (0, 0)))

    # Zero-pad weights/biases to lane-aligned shapes; cast weights to bf16,
    # keep biases in f32 (they add to the f32 accumulator).
    w1p = jnp.pad(w1, ((0, 0), (0, HID_PAD - w1.shape[1]))).astype(jnp.bfloat16)
    b1p = jnp.pad(b1, ((0, 0), (0, HID_PAD - b1.shape[1]))).astype(jnp.float32)
    w3p = jnp.pad(w3, ((0, HID_PAD - w3.shape[0]),
                       (0, out_pad - output_dim))).astype(jnp.bfloat16)
    b3p = jnp.pad(b3, ((0, 0), (0, out_pad - output_dim))).astype(jnp.float32)

    grid = (b_pad // tb,)
    flops = 2 * b_pad * (IN_DIM * HID_PAD + HID_PAD * out_pad)
    bytes_accessed = (x.size * 2 + w1p.size * 2 + w3p.size * 2
                      + b1p.size * 4 + b3p.size * 4 + b_pad * out_pad * 4)

    out = pl.pallas_call(
        mnist_encoder_kernel,
        out_shape=jax.ShapeDtypeStruct((b_pad, out_pad), jnp.float32),
        grid_spec=pltpu.PrefetchScalarGridSpec(
            num_scalar_prefetch=0,
            grid=grid,
            in_specs=[
                # x tiles walk the batch; weights/biases stay resident.
                pl.BlockSpec((tb, IN_DIM), lambda i: (i, 0)),
                pl.BlockSpec((IN_DIM, HID_PAD), lambda i: (0, 0)),
                pl.BlockSpec((1, HID_PAD), lambda i: (0, 0)),
                pl.BlockSpec((HID_PAD, out_pad), lambda i: (0, 0)),
                pl.BlockSpec((1, out_pad), lambda i: (0, 0)),
            ],
            out_specs=pl.BlockSpec((tb, out_pad), lambda i: (i, 0)),
        ),
        compiler_params=pltpu.CompilerParams(
            dimension_semantics=("parallel",),      # shard batch over 2 TCs on v7x
            vmem_limit_bytes=48 * 1024 * 1024,       # headroom; well under v7x 64 MiB
        ),
        cost_estimate=pl.CostEstimate(
            flops=flops, transcendentals=0, bytes_accessed=bytes_accessed),
    )(x, w1p, b1p, w3p, b3p)

    return out[:B, :output_dim]


def init_params(key, output_dim):
    """Deterministic synthetic parameters with nn.Linear shapes (transposed)."""
    k1, k2, k3, k4 = jax.random.split(key, 4)
    # torch fc1.weight is (400, 784); we store its transpose (784, 400).
    w1 = jax.random.normal(k1, (IN_DIM, HID_DIM), dtype=jnp.float32) * 0.02
    b1 = jax.random.normal(k2, (1, HID_DIM), dtype=jnp.float32) * 0.02
    # torch fc3.weight is (output_dim, 400); we store (400, output_dim).
    w3 = jax.random.normal(k3, (HID_DIM, output_dim), dtype=jnp.float32) * 0.02
    b3 = jax.random.normal(k4, (1, output_dim), dtype=jnp.float32) * 0.02
    return w1, b1, w3, b3


def reference(x_nchw, w1, b1, w3, b3):
    """Pure-JAX reference using the same bf16-weight / f32-accumulate recipe."""
    B = x_nchw.shape[0]
    x = x_nchw.reshape(B, IN_DIM).astype(jnp.bfloat16)
    h = jnp.dot(x, w1.astype(jnp.bfloat16),
                preferred_element_type=jnp.float32) + b1
    h = jnp.maximum(h, 0.0)
    z = jnp.dot(h.astype(jnp.bfloat16), w3.astype(jnp.bfloat16),
                preferred_element_type=jnp.float32) + b3
    return z.reshape(B, w3.shape[1])


if __name__ == "__main__":
    key = jax.random.PRNGKey(0)
    kx, kp = jax.random.split(key)

    batch = 2
    output_dim = 32

    # MNIST-like NCHW input: (B, 1, 28, 28)
    x = jax.random.normal(kx, (batch, 1, 28, 28), dtype=jnp.float32)
    w1, b1, w3, b3 = init_params(kp, output_dim)

    z = mnist_encoder(x, w1, b1, w3, b3)
    z = jax.block_until_ready(z)

    z_ref = reference(x, w1, b1, w3, b3)
    assert z.shape == (batch, output_dim)
    assert jnp.allclose(z, z_ref, atol=1e-2, rtol=2e-2), (
        float(jnp.max(jnp.abs(z - z_ref))))

    print("KERNEL_OK")
</pallas_src>

<mosaic_0001>
module attributes {stable_mosaic.version = 11 : i64} {
  func.func @mnist_encoder_kernel(%arg0: i32, %arg1: memref<8x784xbf16, #tpu.memory_space<vmem>>, %arg2: memref<784x512xbf16, #tpu.memory_space<vmem>>, %arg3: memref<1x512xf32, #tpu.memory_space<vmem>>, %arg4: memref<512x128xbf16, #tpu.memory_space<vmem>>, %arg5: memref<1x128xf32, #tpu.memory_space<vmem>>, %arg6: memref<8x128xf32, #tpu.memory_space<vmem>>) attributes {dimension_semantics = [#tpu.dimension_semantics<parallel>], iteration_bounds = array<i64: 1>, scalar_prefetch = 0 : i64, scratch_operands = 0 : i64, tpu.core_type = #tpu.core_type<tc>, window_params = [{transform_indices = @transform_0, window_bounds = array<i64: 8, 784>}, {pipeline_mode = #tpu.pipeline_mode<synchronous>, transform_indices = @transform_1, window_bounds = array<i64: 784, 512>}, {pipeline_mode = #tpu.pipeline_mode<synchronous>, transform_indices = @transform_2, window_bounds = array<i64: 1, 512>}, {pipeline_mode = #tpu.pipeline_mode<synchronous>, transform_indices = @transform_3, window_bounds = array<i64: 512, 128>}, {pipeline_mode = #tpu.pipeline_mode<synchronous>, transform_indices = @transform_4, window_bounds = array<i64: 1, 128>}, {transform_indices = @transform_5, window_bounds = array<i64: 8, 128>}]} {
    %c0 = arith.constant 0 : index
    %c0_0 = arith.constant 0 : index
    %0 = vector.load %arg1[%c0, %c0_0] : memref<8x784xbf16, #tpu.memory_space<vmem>>, vector<8x784xbf16>
    %c0_1 = arith.constant 0 : index
    %c0_2 = arith.constant 0 : index
    %1 = vector.load %arg2[%c0_1, %c0_2] : memref<784x512xbf16, #tpu.memory_space<vmem>>, vector<784x512xbf16>
    %cst = arith.constant dense<0.000000e+00> : vector<8x512xf32>
    %2 = tpu.matmul %0, %1, %cst {dimension_numbers = #tpu.dot_dimension_numbers<[1], [0], [0], [1], [0, 0, 1, 1], [], []>} : vector<8x784xbf16>, vector<784x512xbf16>, vector<8x512xf32> -> vector<8x512xf32>
    %c0_3 = arith.constant 0 : index
    %c0_4 = arith.constant 0 : index
    %3 = vector.load %arg3[%c0_3, %c0_4] : memref<1x512xf32, #tpu.memory_space<vmem>>, vector<1x512xf32>
    %4 = vector.broadcast %3 : vector<1x512xf32> to vector<8x512xf32>
    %5 = arith.addf %2, %4 : vector<8x512xf32>
    %cst_5 = arith.constant 0.000000e+00 : f32
    %6 = vector.broadcast %cst_5 : f32 to vector<8x512xf32>
    %7 = arith.maximumf %5, %6 : vector<8x512xf32>
    %8 = arith.truncf %7 : vector<8x512xf32> to vector<8x512xbf16>
    %c0_6 = arith.constant 0 : index
    %c0_7 = arith.constant 0 : index
    %9 = vector.load %arg4[%c0_6, %c0_7] : memref<512x128xbf16, #tpu.memory_space<vmem>>, vector<512x128xbf16>
    %cst_8 = arith.constant dense<0.000000e+00> : vector<8x128xf32>
    %10 = tpu.matmul %8, %9, %cst_8 {dimension_numbers = #tpu.dot_dimension_numbers<[1], [0], [0], [1], [0, 0, 1, 1], [], []>} : vector<8x512xbf16>, vector<512x128xbf16>, vector<8x128xf32> -> vector<8x128xf32>
    %c0_9 = arith.constant 0 : index
    %c0_10 = arith.constant 0 : index
    %11 = vector.load %arg5[%c0_9, %c0_10] : memref<1x128xf32, #tpu.memory_space<vmem>>, vector<1x128xf32>
    %12 = vector.broadcast %11 : vector<1x128xf32> to vector<8x128xf32>
    %13 = arith.addf %10, %12 : vector<8x128xf32>
    %c0_11 = arith.constant 0 : index
    %c0_12 = arith.constant 0 : index
    %14 = vector.load %arg6[%c0_11, %c0_12] : memref<8x128xf32, #tpu.memory_space<vmem>>, vector<8x128xf32>
    tpu.vector_store %arg6[%c0_11, %c0_12], %13 {strides = array<i32>} : memref<8x128xf32, #tpu.memory_space<vmem>>, vector<8x128xf32>,
    return
  }
  func.func @transform_0(%arg0: i32) -> (i32, i32) {
    %c0_i32 = arith.constant 0 : i32
    %c0_i32_0 = arith.constant 0 : i32
    return %arg0, %c0_i32 : i32, i32
  }
  func.func @transform_1(%arg0: i32) -> (i32, i32) {
    %c0_i32 = arith.constant 0 : i32
    %c0_i32_0 = arith.constant 0 : i32
    %c0_i32_1 = arith.constant 0 : i32
    return %c0_i32, %c0_i32_0 : i32, i32
  }
  func.func @transform_2(%arg0: i32) -> (i32, i32) {
    %c0_i32 = arith.constant 0 : i32
    %c0_i32_0 = arith.constant 0 : i32
    %c0_i32_1 = arith.constant 0 : i32
    return %c0_i32, %c0_i32_0 : i32, i32
  }
  func.func @transform_3(%arg0: i32) -> (i32, i32) {
    %c0_i32 = arith.constant 0 : i32
    %c0_i32_0 = arith.constant 0 : i32
    %c0_i32_1 = arith.constant 0 : i32
    return %c0_i32, %c0_i32_0 : i32, i32
  }
  func.func @transform_4(%arg0: i32) -> (i32, i32) {
    %c0_i32 = arith.constant 0 : i32
    %c0_i32_0 = arith.constant 0 : i32
    %c0_i32_1 = arith.constant 0 : i32
    return %c0_i32, %c0_i32_0 : i32, i32
  }
  func.func @transform_5(%arg0: i32) -> (i32, i32) {
    %c0_i32 = arith.constant 0 : i32
    %c0_i32_0 = arith.constant 0 : i32
    return %arg0, %c0_i32 : i32, i32
  }
}

</mosaic_0001>

<bundles_post_ra>
// kernel: tpu_custom_call.1
= control target key start
LH: loop header
LB: loop body
LE: loop exit
PB: predicated region body
PF: predicated region fallthrough
CT: control target
= control target key end

     0   :  { %10 = vsyncpa [#allocation3], 0  ;;  %s2838_s0 = inlined_call_operand.hbm [shape: bf16[8,784], index: 0, kind: input, shape index: {}]   ;;  %s2839_s1 = inlined_call_operand.hbm [shape: bf16[784,512], index: 1, kind: input, shape index: {}]   ;;  %s2840_s2 = inlined_call_operand.vmem [shape: f32[1,512], index: 2, kind: input, shape index: {}]   ;;  %s2841_s3 = inlined_call_operand.hbm [shape: bf16[512,128], index: 3, kind: input, shape index: {}]   ;;  %s2842_s4 = inlined_call_operand.vmem [shape: f32[1,128], index: 4, kind: input, shape index: {}]   ;;  %s2843_s5 = inlined_call_operand.hbm [shape: f32[8,128], index: 5, kind: output, shape index: {}]  }
   0x1   :  { %11 = vsyncpa [#allocation6], 0 }
   0x2   :  { %12 = vsyncpa [#allocation4], 0  ;;  %s2733_s18 = smov [#allocation5]   ;;  %s2639_s22 = scalar_lea.hbm %s2839_s1, 25088 }
   0x3   :  { %s28_s19 = sshll.u32 %s2733_s18, 4  ;;  %p2640_p0 = scmp.ne.s32.totalorder %s2839_s1, %s2639_s22  ;;  %s29_s19 = int_to_ptr.vmem [resolvable:$true] %s28_s19 }
   0x4   :  { %p2643_p1 = scmp.lt.u32.totalorder %s2639_s22, %s2839_s1 }
   0x6   :  { %p2645_p2 = pnand %p2643_p1, %p2640_p0 }
   0x8   :  { %2648 = shalt.err (!%p2645_p2)
}
   0x9   :  { %s2649_s27 = scalar_lea.vmem %s29_s19, 25088  ;;  %p2654_p4 = scmp.lt.s32.totalorder %s29_s19, %s29_s19 }
   0xa   :  { %p2650_p3 = scmp.ne.s32.totalorder %s29_s19, %s2649_s27  ;;  %p2655_p5 = scmp.lt.s32.totalorder %s2649_s27, %s2649_s27 }
   0xc   :  { %p2656_p6 = por %p2655_p5, %p2654_p4 }
   0xe   :  { %p2657_p7 = pnand %p2656_p6, %p2650_p3 }
  0x10   :  { %2660 = shalt.err (!%p2657_p7)
}
  0x11   :  { %s2734_s28 = smov 256   ;;  %s2735_s29 = smov 16  }
  0x12   :  { %34 = dma.hbm_to_vmem [thread:$0]  %s2839_s1, 25088, %s29_s19, [#allocation6], %s2734_s28, %s2734_s28, %s2735_s29  }
  0x13   :  { %s2736_s7 = smov [#allocation2]   ;;  %s2737_s9 = smov [#allocation7]  }
  0x14   :  { %s19_s8 = sshll.u32 %s2736_s7, 4  ;;  %s42_s10 = sshll.u32 %s2737_s9, 4  ;;  %s20_s8 = int_to_ptr.vmem [resolvable:$true] %s19_s8  ;;  %s43_s10 = int_to_ptr.vmem [resolvable:$true] %s42_s10 }
  0x15   :  { %s2661_s13 = scalar_lea.hbm %s2838_s0, 448 }
  0x16   :  { %p2662_p8 = scmp.ne.s32.totalorder %s2838_s0, %s2661_s13  ;;  %p2665_p9 = scmp.lt.u32.totalorder %s2661_s13, %s2838_s0 }
  0x18   :  { %p2667_p10 = pnand %p2665_p9, %p2662_p8 }
  0x1a   :  { %2670 = shalt.err (!%p2667_p10)
}
  0x1b   :  { %s2671_s1 = scalar_lea.vmem %s20_s8, 448  ;;  %p2676_p12 = scmp.lt.s32.totalorder %s20_s8, %s20_s8 }
  0x1c   :  { %p2672_p11 = scmp.ne.s32.totalorder %s20_s8, %s2671_s1  ;;  %p2677_p13 = scmp.lt.s32.totalorder %s2671_s1, %s2671_s1 }
  0x1e   :  { %p2678_p0 = por %p2677_p13, %p2676_p12 }
  0x20   :  { %p2679_p1 = pnand %p2678_p0, %p2672_p11 }
  0x22   :  { %2682 = shalt.err (!%p2679_p1)
}
  0x23   :  { %22 = dma.hbm_to_vmem [thread:$0]  %s2838_s0, 448, %s20_s8, [#allocation3]  }
  0x24   :  { %s2683_s22 = scalar_lea.hbm %s2841_s3, 4096 }
  0x25   :  { %p2684_p2 = scmp.ne.s32.totalorder %s2841_s3, %s2683_s22  ;;  %p2687_p3 = scmp.lt.u32.totalorder %s2683_s22, %s2841_s3 }
  0x27   :  { %p2689_p4 = pnand %p2687_p3, %p2684_p2 }
  0x29   :  { %2692 = shalt.err (!%p2689_p4)
}
  0x2a   :  { %s2693_s27 = scalar_lea.vmem %s43_s10, 4096  ;;  %p2698_p6 = scmp.lt.s32.totalorder %s43_s10, %s43_s10 }
  0x2b   :  { %p2694_p5 = scmp.ne.s32.totalorder %s43_s10, %s2693_s27  ;;  %p2699_p7 = scmp.lt.s32.totalorder %s2693_s27, %s2693_s27 }
  0x2d   :  { %p2700_p8 = por %p2699_p7, %p2698_p6 }
  0x2f   :  { %p2701_p9 = pnand %p2700_p8, %p2694_p5 }
  0x31   :  { %2704 = shalt.err (!%p2701_p9)
}
  0x32   :  { %s2738_s0 = smov 64   ;;  %s2739_s28 = smov 4  }
  0x33   :  { %48 = dma.hbm_to_vmem [thread:$0]  %s2841_s3, 4096, %s43_s10, [#allocation6], %s2738_s0, %s2738_s0, %s2739_s28  }
  0x34   :  { %2727 = dma.done.wait [#allocation3], 448  }
  0x35   :  { %2728 = vsyncadd [#allocation3], 4294966848 }
  0x36   :  { %2729 = dma.done.wait [#allocation6], 29184  }
  0x37   :  { %2730 = vsyncadd [#allocation6], 4294938112  ;;  %v2306_v0 = vld [vmem:[#allocation5 + $0x4] ss:$16 sps:$4 sm:$0xff]   ;;  %v2308_v1 = vld [vmem:[#allocation5 + $0xc] ss:$16 sps:$4 sm:$0xff]  }
  0x38   :  { %1291 = vmatprep.subr.bf16.mxu0 %v2306_v0  ;;  %v2310_v2 = vld [vmem:[#allocation5] ss:$16 sps:$4 sm:$0xff]   ;;  %v2311_v3 = vld [vmem:[#allocation5 + $0x8] ss:$16 sps:$4 sm:$0xff]   ;;  %1455 = vmatprep.subr.bf16.mxu1 %v2308_v1  ;;  %v2312_v4 = vld [vmem:[#allocation5 + $0x24] ss:$16 sps:$4 sm:$0xff]  }
  0x39   :  { %1292 = vmatpush1.bf16.msra.mxu0 %v2310_v2  ;;  %1456 = vmatpush1.bf16.msra.mxu1 %v2311_v3  ;;  %v2314_v5 = vld [vmem:[#allocation5 + $0x2c] ss:$16 sps:$4 sm:$0xff]   ;;  %v2316_v6 = vld [vmem:[#allocation5 + $0x20] ss:$16 sps:$4 sm:$0xff]   ;;  %v2317_v7 = vld [vmem:[#allocation5 + $0x28] ss:$16 sps:$4 sm:$0xff]  }
  0x3a   :  { %1293 = vmatprep.subr.bf16.mxu0 %v2312_v4  ;;  %1457 = vmatprep.subr.bf16.mxu1 %v2314_v5  ;;  %v2318_v8 = vld [vmem:[#allocation5 + $0x44] ss:$16 sps:$4 sm:$0xff]   ;;  %v2320_v9 = vld [vmem:[#allocation5 + $0x4c] ss:$16 sps:$4 sm:$0xff]   ;;  %v2322_v10 = vld [vmem:[#allocation5 + $0x40] ss:$16 sps:$4 sm:$0xff]  }
  0x3b   :  { %v2323_v11 = vld [vmem:[#allocation5 + $0x48] ss:$16 sps:$4 sm:$0xff]   ;;  %v2324_v12 = vld [vmem:[#allocation5 + $0x64] ss:$16 sps:$4 sm:$0xff]   ;;  %v2326_v13 = vld [vmem:[#allocation5 + $0x6c] ss:$16 sps:$4 sm:$0xff]  }
  0x3c   :  { %v2328_v14 = vld [vmem:[#allocation5 + $0x60] ss:$16 sps:$4 sm:$0xff]   ;;  %v2329_v15 = vld [vmem:[#allocation5 + $0x68] ss:$16 sps:$4 sm:$0xff]   ;;  %v2330_v16 = vld [vmem:[#allocation5 + $0x84] ss:$16 sps:$4 sm:$0xff]  }
  0x3d   :  { %1294 = vmatpush1.bf16.msra.mxu0 %v2316_v6  ;;  %1458 = vmatpush1.bf16.msra.mxu1 %v2317_v7  ;;  %v2332_v17 = vld [vmem:[#allocation5 + $0x8c] ss:$16 sps:$4 sm:$0xff]   ;;  %v2334_v18 = vld [vmem:[#allocation5 + $0x80] ss:$16 sps:$4 sm:$0xff]   ;;  %v2335_v19 = vld [vmem:[#allocation5 + $0x88] ss:$16 sps:$4 sm:$0xff]  }
  0x3e   :  { %1295 = vmatprep.subr.bf16.mxu0 %v2318_v8  ;;  %1459 = vmatprep.subr.bf16.mxu1 %v2320_v9  ;;  %v2336_v20 = vld [vmem:[#allocation5 + $0xa4] ss:$16 sps:$4 sm:$0xff]   ;;  %v2338_v21 = vld [vmem:[#allocation5 + $0xac] ss:$16 sps:$4 sm:$0xff]   ;;  %v2340_v22 = vld [vmem:[#allocation5 + $0xa0] ss:$16 sps:$4 sm:$0xff]  }
  0x3f   :  { %v2341_v23 = vld [vmem:[#allocation5 + $0xa8] ss:$16 sps:$4 sm:$0xff]   ;;  %v2342_v24 = vld [vmem:[#allocation5 + $0xc4] ss:$16 sps:$4 sm:$0xff]   ;;  %v2344_v25 = vld [vmem:[#allocation5 + $0xcc] ss:$16 sps:$4 sm:$0xff]  }
  0x40   :  { %v2346_v26 = vld [vmem:[#allocation5 + $0xc0] ss:$16 sps:$4 sm:$0xff]   ;;  %v2347_v27 = vld [vmem:[#allocation5 + $0xc8] ss:$16 sps:$4 sm:$0xff]   ;;  %v2348_v28 = vld [vmem:[#allocation5 + $0xe4] ss:$16 sps:$4 sm:$0xff]  }
  0x41   :  { %1296 = vmatpush1.bf16.msra.mxu0 %v2322_v10  ;;  %1460 = vmatpush1.bf16.msra.mxu1 %v2323_v11  ;;  %v2350_v29 = vld [vmem:[#allocation5 + $0xec] ss:$16 sps:$4 sm:$0xff]   ;;  %v2352_v30 = vld [vmem:[#allocation5 + $0xe0] ss:$16 sps:$4 sm:$0xff]   ;;  %v2353_v31 = vld [vmem:[#allocation5 + $0xe8] ss:$16 sps:$4 sm:$0xff]  }
  0x42   :  { %1297 = vmatprep.subr.bf16.mxu0 %v2324_v12  ;;  %1461 = vmatprep.subr.bf16.mxu1 %v2326_v13  ;;  %v2354_v32 = vld [vmem:[#allocation5 + $0x104] ss:$16 sps:$4 sm:$0xff]   ;;  %v2356_v33 = vld [vmem:[#allocation5 + $0x10c] ss:$16 sps:$4 sm:$0xff]   ;;  %v2358_v34 = vld [vmem:[#allocation5 + $0x100] ss:$16 sps:$4 sm:$0xff]  }
  0x43   :  { %v2359_v35 = vld [vmem:[#allocation5 + $0x108] ss:$16 sps:$4 sm:$0xff]   ;;  %v2360_v36 = vld [vmem:[#allocation5 + $0x124] ss:$16 sps:$4 sm:$0xff]   ;;  %v2362_v37 = vld [vmem:[#allocation5 + $0x12c] ss:$16 sps:$4 sm:$0xff]  }
  0x44   :  { %v2364_v38 = vld [vmem:[#allocation5 + $0x120] ss:$16 sps:$4 sm:$0xff]   ;;  %v2365_v39 = vld [vmem:[#allocation5 + $0x128] ss:$16 sps:$4 sm:$0xff]   ;;  %v2366_v40 = vld [vmem:[#allocation5 + $0x144] ss:$16 sps:$4 sm:$0xff]  }
  0x45   :  { %1298 = vmatpush1.bf16.msra.mxu0 %v2328_v14  ;;  %1462 = vmatpush1.bf16.msra.mxu1 %v2329_v15  ;;  %v2368_v41 = vld [vmem:[#allocation5 + $0x14c] ss:$16 sps:$4 sm:$0xff]   ;;  %v2370_v42 = vld [vmem:[#allocation5 + $0x140] ss:$16 sps:$4 sm:$0xff]   ;;  %v2371_v43 = vld [vmem:[#allocation5 + $0x148] ss:$16 sps:$4 sm:$0xff]  }
  0x46   :  { %1299 = vmatprep.subr.bf16.mxu0 %v2330_v16  ;;  %1463 = vmatprep.subr.bf16.mxu1 %v2332_v17  ;;  %v2372_v44 = vld [vmem:[#allocation5 + $0x164] ss:$16 sps:$4 sm:$0xff]   ;;  %v2374_v45 = vld [vmem:[#allocation5 + $0x16c] ss:$16 sps:$4 sm:$0xff]   ;;  %v2376_v47 = vld [vmem:[#allocation5 + $0x160] ss:$16 sps:$4 sm:$0xff]  }
  0x47   :  { %v61_v46 = vld [vmem:[#allocation2] sm:$0xff]  ;;  %v2380_v51 = vld [vmem:[#allocation5 + $0x18c] ss:$16 sps:$4 sm:$0xff]   ;;  %v2382_v52 = vld [vmem:[#allocation5 + $0x180] ss:$16 sps:$4 sm:$0xff]   ;;  %vm1287_vm0 = vcmask 130048  }
  0x48   :  { %v1988_v48 = vcombine.high %v61_v46, %v61_v46  ;;  %v2377_v49 = vld [vmem:[#allocation5 + $0x168] ss:$16 sps:$4 sm:$0xff]   ;;  %v2378_v50 = vld [vmem:[#allocation5 + $0x184] ss:$16 sps:$4 sm:$0xff]   ;;  %v2386_v55 = vld [vmem:[#allocation5 + $0x1ac] ss:$16 sps:$4 sm:$0xff]   ;;  %v1987_v4 = vcombine.low %v61_v46, %v61_v46 }
  0x49   :  { %1300 = vmatpush1.bf16.msra.mxu0 %v2334_v18  ;;  %1464 = vmatpush1.bf16.msra.mxu1 %v2335_v19  ;;  %v2383_v53 = vld [vmem:[#allocation5 + $0x188] ss:$16 sps:$4 sm:$0xff]   ;;  %v2384_v54 = vld [vmem:[#allocation5 + $0x1a4] ss:$16 sps:$4 sm:$0xff]   ;;  %v2388_v56 = vld [vmem:[#allocation5 + $0x1a0] ss:$16 sps:$4 sm:$0xff]  }
  0x4a   :  { %1301 = vmatprep.subr.bf16.mxu0 %v2336_v20  ;;  %1465 = vmatprep.subr.bf16.mxu1 %v2338_v21  ;;  %v2389_v57 = vld [vmem:[#allocation5 + $0x1a8] ss:$16 sps:$4 sm:$0xff]   ;;  %v2390_v58 = vld [vmem:[#allocation5 + $0x1c4] ss:$16 sps:$4 sm:$0xff]   ;;  %v2392_v59 = vld [vmem:[#allocation5 + $0x1cc] ss:$16 sps:$4 sm:$0xff]  }
  0x4b   :  { %1323 = vmatprep.mubr.bf16.mxu0 %v1988_v48  ;;  %1487 = vmatprep.mubr.bf16.mxu1 %v1988_v48  ;;  %v2394_v60 = vld [vmem:[#allocation5 + $0x1c0] ss:$16 sps:$4 sm:$0xff]   ;;  %v2395_v61 = vld [vmem:[#allocation5 + $0x1c8] ss:$16 sps:$4 sm:$0xff]   ;;  %v2396_v62 = vld [vmem:[#allocation5 + $0x1e4] ss:$16 sps:$4 sm:$0xff]  }
  0x4c   :  { %v2398_v63 = vld [vmem:[#allocation5 + $0x1ec] ss:$16 sps:$4 sm:$0xff]   ;;  %v2400_v0 = vld [vmem:[#allocation5 + $0x1e0] ss:$16 sps:$4 sm:$0xff]   ;;  %v2401_v1 = vld [vmem:[#allocation5 + $0x1e8] ss:$16 sps:$4 sm:$0xff]  }
  0x4d   :  { %1302 = vmatpush1.bf16.msra.mxu0 %v2340_v22  ;;  %1466 = vmatpush1.bf16.msra.mxu1 %v2341_v23  ;;  %v2406_v2 = vld [vmem:[#allocation5 + $0x204] ss:$16 sps:$4 sm:$0xff]   ;;  %v2409_v3 = vld [vmem:[#allocation5 + $0x20c] ss:$16 sps:$4 sm:$0xff]   ;;  %v2404_v5 = vld [vmem:[#allocation5 + $0x200] ss:$16 sps:$4 sm:$0xff]  }
  0x4e   :  { %1303 = vmatprep.subr.bf16.mxu0 %v2342_v24  ;;  %1467 = vmatprep.subr.bf16.mxu1 %v2344_v25  ;;  %v2407_v6 = vld [vmem:[#allocation5 + $0x208] ss:$16 sps:$4 sm:$0xff]   ;;  %v2412_v7 = vld [vmem:[#allocation5 + $0x224] ss:$16 sps:$4 sm:$0xff]   ;;  %v2415_v8 = vld [vmem:[#allocation5 + $0x22c] ss:$16 sps:$4 sm:$0xff]  }
  0x4f   :  { %v2410_v9 = vld [vmem:[#allocation5 + $0x220] ss:$16 sps:$4 sm:$0xff]   ;;  %v2413_v10 = vld [vmem:[#allocation5 + $0x228] ss:$16 sps:$4 sm:$0xff]   ;;  %v2418_v11 = vld [vmem:[#allocation5 + $0x244] ss:$16 sps:$4 sm:$0xff]  }
  0x50   :  { %v2421_v12 = vld [vmem:[#allocation5 + $0x24c] ss:$16 sps:$4 sm:$0xff]   ;;  %v2416_v13 = vld [vmem:[#allocation5 + $0x240] ss:$16 sps:$4 sm:$0xff]   ;;  %v2419_v14 = vld [vmem:[#allocation5 + $0x248] ss:$16 sps:$4 sm:$0xff]  }
  0x51   :  { %1304 = vmatpush1.bf16.msra.mxu0 %v2346_v26  ;;  %1468 = vmatpush1.bf16.msra.mxu1 %v2347_v27  ;;  %v2424_v15 = vld [vmem:[#allocation5 + $0x264] ss:$16 sps:$4 sm:$0xff]   ;;  %v2427_v16 = vld [vmem:[#allocation5 + $0x26c] ss:$16 sps:$4 sm:$0xff]   ;;  %v2422_v17 = vld [vmem:[#allocation5 + $0x260] ss:$16 sps:$4 sm:$0xff]  }
  0x52   :  { %1305 = vmatprep.subr.bf16.mxu0 %v2348_v28  ;;  %1469 = vmatprep.subr.bf16.mxu1 %v2350_v29  ;;  %v2425_v18 = vld [vmem:[#allocation5 + $0x268] ss:$16 sps:$4 sm:$0xff]   ;;  %v2430_v19 = vld [vmem:[#allocation5 + $0x284] ss:$16 sps:$4 sm:$0xff]   ;;  %v2433_v20 = vld [vmem:[#allocation5 + $0x28c] ss:$16 sps:$4 sm:$0xff]  }
  0x53   :  { %v2428_v21 = vld [vmem:[#allocation5 + $0x280] ss:$16 sps:$4 sm:$0xff]   ;;  %v2431_v22 = vld [vmem:[#allocation5 + $0x288] ss:$16 sps:$4 sm:$0xff]   ;;  %v2436_v23 = vld [vmem:[#allocation5 + $0x2a4] ss:$16 sps:$4 sm:$0xff]  }
  0x54   :  { %v2439_v24 = vld [vmem:[#allocation5 + $0x2ac] ss:$16 sps:$4 sm:$0xff]   ;;  %v2434_v25 = vld [vmem:[#allocation5 + $0x2a0] ss:$16 sps:$4 sm:$0xff]   ;;  %v2437_v26 = vld [vmem:[#allocation5 + $0x2a8] ss:$16 sps:$4 sm:$0xff]  }
  0x55   :  { %1306 = vmatpush1.bf16.msra.mxu0 %v2352_v30  ;;  %1470 = vmatpush1.bf16.msra.mxu1 %v2353_v31  ;;  %v2442_v27 = vld [vmem:[#allocation5 + $0x2c4] ss:$16 sps:$4 sm:$0xff]   ;;  %v2445_v28 = vld [vmem:[#allocation5 + $0x2cc] ss:$16 sps:$4 sm:$0xff]   ;;  %v2440_v31 = vld [vmem:[#allocation5 + $0x2c0] ss:$16 sps:$4 sm:$0xff]  }
  0x56   :  { %1307 = vmatprep.subr.bf16.mxu0 %v2354_v32  ;;  %1471 = vmatprep.subr.bf16.mxu1 %v2356_v33  ;;  %v2808_v29 = vld [vmem:[#allocation2 + $0x8] sm:$0xff]  ;;  %v2443_v32 = vld [vmem:[#allocation5 + $0x2c8] ss:$16 sps:$4 sm:$0xff]   ;;  %v2448_v33 = vld [vmem:[#allocation5 + $0x2e4] ss:$16 sps:$4 sm:$0xff]   ;;  %s2741_s8 = smov [#allocation8]  }
  0x57   :  { %v1990_v30 = vcombine.high %v2808_v29, %v2808_v29  ;;  %v2469_v46 = vld [vmem:[#allocation5 + $0x34c] ss:$16 sps:$4 sm:$0xff]   ;;  %v2467_v48 = vld [vmem:[#allocation5 + $0x348] ss:$16 sps:$4 sm:$0xff]   ;;  %s1977_s9 = sshll.u32 %s2741_s8, 4  ;;  %s1978_s9 = int_to_ptr.vmem [resolvable:$true] %s1977_s9 }
  0x58   :  { %s2705_s10 = scalar_lea.vmem %s1978_s9, 128  ;;  %p2710_p11 = scmp.lt.s32.totalorder %s1978_s9, %s1978_s9 }
  0x59   :  { %1308 = vmatpush1.bf16.msra.mxu0 %v2358_v34  ;;  %1472 = vmatpush1.bf16.msra.mxu1 %v2359_v35  ;;  %v2451_v34 = vld [vmem:[#allocation5 + $0x2ec] ss:$16 sps:$4 sm:$0xff]   ;;  %v2446_v35 = vld [vmem:[#allocation5 + $0x2e0] ss:$16 sps:$4 sm:$0xff]   ;;  %p2706_p10 = scmp.ne.s32.totalorder %s1978_s9, %s2705_s10  ;;  %p2711_p12 = scmp.lt.s32.totalorder %s2705_s10, %s2705_s10 }
  0x5a   :  { %1309 = vmatprep.subr.bf16.mxu0 %v2360_v36  ;;  %1473 = vmatprep.subr.bf16.mxu1 %v2362_v37  ;;  %v2449_v36 = vld [vmem:[#allocation5 + $0x2e8] ss:$16 sps:$4 sm:$0xff]   ;;  %v2454_v37 = vld [vmem:[#allocation5 + $0x304] ss:$16 sps:$4 sm:$0xff]  }
  0x5b   :  { %p2712_p13 = por %p2711_p12, %p2710_p11 }
  0x5d   :  { %1310 = vmatpush1.bf16.msra.mxu0 %v2364_v38  ;;  %1474 = vmatpush1.bf16.msra.mxu1 %v2365_v39  ;;  %v2457_v38 = vld [vmem:[#allocation5 + $0x30c] ss:$16 sps:$4 sm:$0xff]   ;;  %v2452_v39 = vld [vmem:[#allocation5 + $0x300] ss:$16 sps:$4 sm:$0xff]   ;;  %p2713_p0 = pnand %p2712_p13, %p2706_p10 }
  0x5e   :  { %1311 = vmatprep.subr.bf16.mxu0 %v2366_v40  ;;  %1475 = vmatprep.subr.bf16.mxu1 %v2368_v41  ;;  %v2455_v40 = vld [vmem:[#allocation5 + $0x308] ss:$16 sps:$4 sm:$0xff]   ;;  %v2460_v41 = vld [vmem:[#allocation5 + $0x324] ss:$16 sps:$4 sm:$0xff]  }
  0x61   :  { %1312 = vmatpush1.bf16.msra.mxu0 %v2370_v42  ;;  %1476 = vmatpush1.bf16.msra.mxu1 %v2371_v43  ;;  %v2463_v42 = vld [vmem:[#allocation5 + $0x32c] ss:$16 sps:$4 sm:$0xff]   ;;  %v2458_v43 = vld [vmem:[#allocation5 + $0x320] ss:$16 sps:$4 sm:$0xff]  }
  0x62   :  { %1313 = vmatprep.subr.bf16.mxu0 %v2372_v44  ;;  %1477 = vmatprep.subr.bf16.mxu1 %v2374_v45  ;;  %v2461_v44 = vld [vmem:[#allocation5 + $0x328] ss:$16 sps:$4 sm:$0xff]   ;;  %v2466_v45 = vld [vmem:[#allocation5 + $0x344] ss:$16 sps:$4 sm:$0xff]  }
  0x65   :  { %1314 = vmatpush1.bf16.msra.mxu0 %v2376_v47  ;;  %1478 = vmatpush1.bf16.msra.mxu1 %v2377_v49  ;;  %v2464_v47 = vld [vmem:[#allocation5 + $0x340] ss:$16 sps:$4 sm:$0xff]   ;;  %v2472_v49 = vld [vmem:[#allocation5 + $0x364] ss:$16 sps:$4 sm:$0xff]  }
  0x66   :  { %1315 = vmatprep.subr.bf16.mxu0 %v2378_v50  ;;  %1479 = vmatprep.subr.bf16.mxu1 %v2380_v51  ;;  %v2475_v50 = vld [vmem:[#allocation5 + $0x36c] ss:$16 sps:$4 sm:$0xff]   ;;  %v2470_v51 = vld [vmem:[#allocation5 + $0x360] ss:$16 sps:$4 sm:$0xff]  }
  0x69   :  { %1316 = vmatpush1.bf16.msra.mxu0 %v2382_v52  ;;  %1480 = vmatpush1.bf16.msra.mxu1 %v2383_v53  ;;  %v2473_v52 = vld [vmem:[#allocation5 + $0x368] ss:$16 sps:$4 sm:$0xff]   ;;  %v2478_v53 = vld [vmem:[#allocation5 + $0x384] ss:$16 sps:$4 sm:$0xff]  }
  0x6a   :  { %1317 = vmatprep.subr.bf16.mxu0 %v2384_v54  ;;  %1481 = vmatprep.subr.bf16.mxu1 %v2386_v55  ;;  %v2481_v54 = vld [vmem:[#allocation5 + $0x38c] ss:$16 sps:$4 sm:$0xff]   ;;  %v2476_v55 = vld [vmem:[#allocation5 + $0x380] ss:$16 sps:$4 sm:$0xff]  }
  0x6d   :  { %1318 = vmatpush1.bf16.msra.mxu0 %v2388_v56  ;;  %1482 = vmatpush1.bf16.msra.mxu1 %v2389_v57  ;;  %v2479_v56 = vld [vmem:[#allocation5 + $0x388] ss:$16 sps:$4 sm:$0xff]   ;;  %v2484_v57 = vld [vmem:[#allocation5 + $0x3a4] ss:$16 sps:$4 sm:$0xff]  }
  0x6e   :  { %1319 = vmatprep.subr.bf16.mxu0 %v2390_v58  ;;  %1483 = vmatprep.subr.bf16.mxu1 %v2392_v59  ;;  %v2487_v58 = vld [vmem:[#allocation5 + $0x3ac] ss:$16 sps:$4 sm:$0xff]   ;;  %v2482_v59 = vld [vmem:[#allocation5 + $0x3a0] ss:$16 sps:$4 sm:$0xff]  }
  0x71   :  { %1320 = vmatpush1.bf16.msra.mxu0 %v2394_v60  ;;  %1484 = vmatpush1.bf16.msra.mxu1 %v2395_v61  ;;  %v2485_v60 = vld [vmem:[#allocation5 + $0x3a8] ss:$16 sps:$4 sm:$0xff]   ;;  %v2490_v61 = vld [vmem:[#allocation5 + $0x3c4] ss:$16 sps:$4 sm:$0xff]  }
  0x72   :  { %1321 = vmatprep.subr.bf16.mxu0 %v2396_v62  ;;  %1485 = vmatprep.subr.bf16.mxu1 %v2398_v63  ;;  %v2493_v62 = vld [vmem:[#allocation5 + $0x3cc] ss:$16 sps:$4 sm:$0xff]   ;;  %v2488_v63 = vld [vmem:[#allocation5 + $0x3c0] ss:$16 sps:$4 sm:$0xff]  }
  0x75   :  { %1322 = vmatpush1.bf16.msra.mxu0 %v2400_v0  ;;  %1486 = vmatpush1.bf16.msra.mxu1 %v2401_v1  ;;  %v2491_v0 = vld [vmem:[#allocation5 + $0x3c8] ss:$16 sps:$4 sm:$0xff]   ;;  %v2496_v1 = vld [vmem:[#allocation5 + $0x3e4] ss:$16 sps:$4 sm:$0xff]  }
  0x76   :  { %1332 = vmatprep.subr.bf16.mxu0 %v2406_v2  ;;  %1496 = vmatprep.subr.bf16.mxu1 %v2409_v3  ;;  %v2499_v2 = vld [vmem:[#allocation5 + $0x3ec] ss:$16 sps:$4 sm:$0xff]   ;;  %v2494_v3 = vld [vmem:[#allocation5 + $0x3e0] ss:$16 sps:$4 sm:$0xff]  }
  0x78   :  { %1324 = vmatmul.mubr.bf16.vlgmr.msra.gmra.mrb[0].mxu0 %v1987_v4  ;;  %1488 = vmatmul.mubr.bf16.vlgmr.msra.gmra.mrb[0].mxu1 %v1987_v4  ;;  %v2497_v4 = vld [vmem:[#allocation5 + $0x3e8] ss:$16 sps:$4 sm:$0xff]  }
  0x79   :  { %1333 = vmatpush1.bf16.msra.mxu0 %v2404_v5  ;;  %1497 = vmatpush1.bf16.msra.mxu1 %v2407_v6  ;;  %v2504_v5 = vld [vmem:[#allocation5 + $0x404] ss:$16 sps:$4 sm:$0xff]   ;;  %v2507_v6 = vld [vmem:[#allocation5 + $0x40c] ss:$16 sps:$4 sm:$0xff]  }
  0x7a   :  { %1334 = vmatprep.subr.bf16.mxu0 %v2412_v7  ;;  %1498 = vmatprep.subr.bf16.mxu1 %v2415_v8  ;;  %v1989_v7 = vcombine.low %v2808_v29, %v2808_v29  ;;  %v2502_v8 = vld [vmem:[#allocation5 + $0x400] ss:$16 sps:$4 sm:$0xff]   ;;  %v2537_v29 = vld [vmem:[#allocation5 + $0x4ac] ss:$16 sps:$4 sm:$0xff]  }
  0x7b   :  { %1364 = vmatprep.mubr.bf16.mxu0 %v1990_v30  ;;  %1528 = vmatprep.mubr.bf16.mxu1 %v1990_v30  ;;  %v2532_v30 = vld [vmem:[#allocation5 + $0x4a0] ss:$16 sps:$4 sm:$0xff]  }
  0x7d   :  { %1335 = vmatpush1.bf16.msra.mxu0 %v2410_v9  ;;  %1499 = vmatpush1.bf16.msra.mxu1 %v2413_v10  ;;  %v2505_v9 = vld [vmem:[#allocation5 + $0x408] ss:$16 sps:$4 sm:$0xff]   ;;  %v2510_v10 = vld [vmem:[#allocation5 + $0x424] ss:$16 sps:$4 sm:$0xff]  }
  0x7e   :  { %1336 = vmatprep.subr.bf16.mxu0 %v2418_v11  ;;  %1500 = vmatprep.subr.bf16.mxu1 %v2421_v12  ;;  %v2814_v11 = vld [vmem:[#allocation2 + $0x10] sm:$0xff]  ;;  %v2513_v12 = vld [vmem:[#allocation5 + $0x42c] ss:$16 sps:$4 sm:$0xff]  }
  0x81   :  { %1337 = vmatpush1.bf16.msra.mxu0 %v2416_v13  ;;  %1501 = vmatpush1.bf16.msra.mxu1 %v2419_v14  ;;  %v1992_v13 = vcombine.high %v2814_v11, %v2814_v11  ;;  %v2508_v14 = vld [vmem:[#allocation5 + $0x420] ss:$16 sps:$4 sm:$0xff]  }
  0x82   :  { %1338 = vmatprep.subr.bf16.mxu0 %v2424_v15  ;;  %1502 = vmatprep.subr.bf16.mxu1 %v2427_v16  ;;  %v2511_v15 = vld [vmem:[#allocation5 + $0x428] ss:$16 sps:$4 sm:$0xff]   ;;  %v2516_v16 = vld [vmem:[#allocation5 + $0x444] ss:$16 sps:$4 sm:$0xff]  }
  0x85   :  { %1339 = vmatpush1.bf16.msra.mxu0 %v2422_v17  ;;  %1503 = vmatpush1.bf16.msra.mxu1 %v2425_v18  ;;  %v2519_v17 = vld [vmem:[#allocation5 + $0x44c] ss:$16 sps:$4 sm:$0xff]   ;;  %v2514_v18 = vld [vmem:[#allocation5 + $0x440] ss:$16 sps:$4 sm:$0xff]  }
  0x86   :  { %1340 = vmatprep.subr.bf16.mxu0 %v2430_v19  ;;  %1504 = vmatprep.subr.bf16.mxu1 %v2433_v20  ;;  %v2517_v19 = vld [vmem:[#allocation5 + $0x448] ss:$16 sps:$4 sm:$0xff]   ;;  %v2522_v20 = vld [vmem:[#allocation5 + $0x464] ss:$16 sps:$4 sm:$0xff]  }
  0x89   :  { %1341 = vmatpush1.bf16.msra.mxu0 %v2428_v21  ;;  %1505 = vmatpush1.bf16.msra.mxu1 %v2431_v22  ;;  %v2525_v21 = vld [vmem:[#allocation5 + $0x46c] ss:$16 sps:$4 sm:$0xff]   ;;  %v2520_v22 = vld [vmem:[#allocation5 + $0x460] ss:$16 sps:$4 sm:$0xff]  }
  0x8a   :  { %1342 = vmatprep.subr.bf16.mxu0 %v2436_v23  ;;  %1506 = vmatprep.subr.bf16.mxu1 %v2439_v24  ;;  %v2523_v23 = vld [vmem:[#allocation5 + $0x468] ss:$16 sps:$4 sm:$0xff]   ;;  %v2528_v24 = vld [vmem:[#allocation5 + $0x484] ss:$16 sps:$4 sm:$0xff]  }
  0x8d   :  { %1343 = vmatpush1.bf16.msra.mxu0 %v2434_v25  ;;  %1507 = vmatpush1.bf16.msra.mxu1 %v2437_v26  ;;  %v2531_v25 = vld [vmem:[#allocation5 + $0x48c] ss:$16 sps:$4 sm:$0xff]   ;;  %v2526_v26 = vld [vmem:[#allocation5 + $0x480] ss:$16 sps:$4 sm:$0xff]  }
  0x8e   :  { %1344 = vmatprep.subr.bf16.mxu0 %v2442_v27  ;;  %1508 = vmatprep.subr.bf16.mxu1 %v2445_v28  ;;  %v2529_v27 = vld [vmem:[#allocation5 + $0x488] ss:$16 sps:$4 sm:$0xff]   ;;  %v2534_v28 = vld [vmem:[#allocation5 + $0x4a4] ss:$16 sps:$4 sm:$0xff]  }
  0x91   :  { %1345 = vmatpush1.bf16.msra.mxu0 %v2440_v31  ;;  %1509 = vmatpush1.bf16.msra.mxu1 %v2443_v32  ;;  %v2535_v31 = vld [vmem:[#allocation5 + $0x4a8] ss:$16 sps:$4 sm:$0xff]   ;;  %v2540_v32 = vld [vmem:[#allocation5 + $0x4c4] ss:$16 sps:$4 sm:$0xff]  }
  0x92   :  { %1346 = vmatprep.subr.bf16.mxu0 %v2448_v33  ;;  %1510 = vmatprep.subr.bf16.mxu1 %v2451_v34  ;;  %v2543_v33 = vld [vmem:[#allocation5 + $0x4cc] ss:$16 sps:$4 sm:$0xff]   ;;  %v2538_v34 = vld [vmem:[#allocation5 + $0x4c0] ss:$16 sps:$4 sm:$0xff]  }
  0x95   :  { %1347 = vmatpush1.bf16.msra.mxu0 %v2446_v35  ;;  %1511 = vmatpush1.bf16.msra.mxu1 %v2449_v36  ;;  %v2541_v35 = vld [vmem:[#allocation5 + $0x4c8] ss:$16 sps:$4 sm:$0xff]   ;;  %v2546_v36 = vld [vmem:[#allocation5 + $0x4e4] ss:$16 sps:$4 sm:$0xff]  }
  0x96   :  { %1348 = vmatprep.subr.bf16.mxu0 %v2454_v37  ;;  %1512 = vmatprep.subr.bf16.mxu1 %v2457_v38  ;;  %v2549_v37 = vld [vmem:[#allocation5 + $0x4ec] ss:$16 sps:$4 sm:$0xff]   ;;  %v2544_v38 = vld [vmem:[#allocation5 + $0x4e0] ss:$16 sps:$4 sm:$0xff]  }
  0x99   :  { %1349 = vmatpush1.bf16.msra.mxu0 %v2452_v39  ;;  %1513 = vmatpush1.bf16.msra.mxu1 %v2455_v40  ;;  %v2547_v39 = vld [vmem:[#allocation5 + $0x4e8] ss:$16 sps:$4 sm:$0xff]   ;;  %v2552_v40 = vld [vmem:[#allocation5 + $0x504] ss:$16 sps:$4 sm:$0xff]  }
  0x9a   :  { %1350 = vmatprep.subr.bf16.mxu0 %v2460_v41  ;;  %1514 = vmatprep.subr.bf16.mxu1 %v2463_v42  ;;  %v2555_v41 = vld [vmem:[#allocation5 + $0x50c] ss:$16 sps:$4 sm:$0xff]   ;;  %v2550_v42 = vld [vmem:[#allocation5 + $0x500] ss:$16 sps:$4 sm:$0xff]  }
  0x9d   :  { %1351 = vmatpush1.bf16.msra.mxu0 %v2458_v43  ;;  %1515 = vmatpush1.bf16.msra.mxu1 %v2461_v44  ;;  %v2553_v43 = vld [vmem:[#allocation5 + $0x508] ss:$16 sps:$4 sm:$0xff]   ;;  %v2558_v44 = vld [vmem:[#allocation5 + $0x524] ss:$16 sps:$4 sm:$0xff]  }
  0x9e   :  { %1352 = vmatprep.subr.bf16.mxu0 %v2466_v45  ;;  %1516 = vmatprep.subr.bf16.mxu1 %v2469_v46  ;;  %v2561_v45 = vld [vmem:[#allocation5 + $0x52c] ss:$16 sps:$4 sm:$0xff]   ;;  %v2556_v46 = vld [vmem:[#allocation5 + $0x520] ss:$16 sps:$4 sm:$0xff]  }
  0xa1   :  { %1353 = vmatpush1.bf16.msra.mxu0 %v2464_v47  ;;  %1517 = vmatpush1.bf16.msra.mxu1 %v2467_v48  ;;  %v2559_v47 = vld [vmem:[#allocation5 + $0x528] ss:$16 sps:$4 sm:$0xff]   ;;  %v2564_v48 = vld [vmem:[#allocation5 + $0x544] ss:$16 sps:$4 sm:$0xff]  }
  0xa2   :  { %1354 = vmatprep.subr.bf16.mxu0 %v2472_v49  ;;  %1518 = vmatprep.subr.bf16.mxu1 %v2475_v50  ;;  %v2567_v49 = vld [vmem:[#allocation5 + $0x54c] ss:$16 sps:$4 sm:$0xff]   ;;  %v2562_v50 = vld [vmem:[#allocation5 + $0x540] ss:$16 sps:$4 sm:$0xff]  }
  0xa5   :  { %1355 = vmatpush1.bf16.msra.mxu0 %v2470_v51  ;;  %1519 = vmatpush1.bf16.msra.mxu1 %v2473_v52  ;;  %v2565_v51 = vld [vmem:[#allocation5 + $0x548] ss:$16 sps:$4 sm:$0xff]   ;;  %v2570_v52 = vld [vmem:[#allocation5 + $0x564] ss:$16 sps:$4 sm:$0xff]  }
  0xa6   :  { %1356 = vmatprep.subr.bf16.mxu0 %v2478_v53  ;;  %1520 = vmatprep.subr.bf16.mxu1 %v2481_v54  ;;  %v2573_v53 = vld [vmem:[#allocation5 + $0x56c] ss:$16 sps:$4 sm:$0xff]   ;;  %v2568_v54 = vld [vmem:[#allocation5 + $0x560] ss:$16 sps:$4 sm:$0xff]  }
  0xa9   :  { %1357 = vmatpush1.bf16.msra.mxu0 %v2476_v55  ;;  %1521 = vmatpush1.bf16.msra.mxu1 %v2479_v56  ;;  %v2571_v55 = vld [vmem:[#allocation5 + $0x568] ss:$16 sps:$4 sm:$0xff]   ;;  %v2576_v56 = vld [vmem:[#allocation5 + $0x584] ss:$16 sps:$4 sm:$0xff]  }
  0xaa   :  { %1358 = vmatprep.subr.bf16.mxu0 %v2484_v57  ;;  %1522 = vmatprep.subr.bf16.mxu1 %v2487_v58  ;;  %v2579_v57 = vld [vmem:[#allocation5 + $0x58c] ss:$16 sps:$4 sm:$0xff]   ;;  %v2574_v58 = vld [vmem:[#allocation5 + $0x580] ss:$16 sps:$4 sm:$0xff]  }
  0xad   :  { %1359 = vmatpush1.bf16.msra.mxu0 %v2482_v59  ;;  %1523 = vmatpush1.bf16.msra.mxu1 %v2485_v60  ;;  %v2577_v59 = vld [vmem:[#allocation5 + $0x588] ss:$16 sps:$4 sm:$0xff]   ;;  %v2582_v60 = vld [vmem:[#allocation5 + $0x5a4] ss:$16 sps:$4 sm:$0xff]  }
  0xae   :  { %1360 = vmatprep.subr.bf16.mxu0 %v2490_v61  ;;  %1524 = vmatprep.subr.bf16.mxu1 %v2493_v62  ;;  %v2585_v61 = vld [vmem:[#allocation5 + $0x5ac] ss:$16 sps:$4 sm:$0xff]   ;;  %v2580_v62 = vld [vmem:[#allocation5 + $0x5a0] ss:$16 sps:$4 sm:$0xff]  }
  0xb1   :  { %1361 = vmatpush1.bf16.msra.mxu0 %v2488_v63  ;;  %1525 = vmatpush1.bf16.msra.mxu1 %v2491_v0  ;;  %v2583_v63 = vld [vmem:[#allocation5 + $0x5a8] ss:$16 sps:$4 sm:$0xff]   ;;  %v2588_v0 = vld [vmem:[#allocation5 + $0x5c4] ss:$16 sps:$4 sm:$0xff]  }
  0xb2   :  { %1362 = vmatprep.subr.bf16.mxu0 %v2496_v1  ;;  %1526 = vmatprep.subr.bf16.mxu1 %v2499_v2  ;;  %v2591_v1 = vld [vmem:[#allocation5 + $0x5cc] ss:$16 sps:$4 sm:$0xff]   ;;  %v2586_v2 = vld [vmem:[#allocation5 + $0x5c0] ss:$16 sps:$4 sm:$0xff]  }
  0xb5   :  { %1363 = vmatpush1.bf16.msra.mxu0 %v2494_v3  ;;  %1527 = vmatpush1.bf16.msra.mxu1 %v2497_v4  ;;  %v2589_v3 = vld [vmem:[#allocation5 + $0x5c8] ss:$16 sps:$4 sm:$0xff]   ;;  %v2594_v4 = vld [vmem:[#allocation5 + $0x5e4] ss:$16 sps:$4 sm:$0xff]  }
  0xb6   :  { %1373 = vmatprep.subr.bf16.mxu0 %v2504_v5  ;;  %1537 = vmatprep.subr.bf16.mxu1 %v2507_v6  ;;  %v2597_v5 = vld [vmem:[#allocation5 + $0x5ec] ss:$16 sps:$4 sm:$0xff]   ;;  %v2592_v6 = vld [vmem:[#allocation5 + $0x5e0] ss:$16 sps:$4 sm:$0xff]  }
  0xb8   :  { %1365 = vmatmul.mubr.bf16.vlgmr.msra.gmra.mrb[0].mxu0 %v1989_v7  ;;  %1529 = vmatmul.mubr.bf16.vlgmr.msra.gmra.mrb[0].mxu1 %v1989_v7  ;;  %v2595_v7 = vld [vmem:[#allocation5 + $0x5e8] ss:$16 sps:$4 sm:$0xff]  }
  0xb9   :  { %1374 = vmatpush1.bf16.msra.mxu0 %v2502_v8  ;;  %1538 = vmatpush1.bf16.msra.mxu1 %v2505_v9  ;;  %v2602_v8 = vld [vmem:[#allocation5 + $0x604] ss:$16 sps:$4 sm:$0xff]   ;;  %v2605_v9 = vld [vmem:[#allocation5 + $0x60c] ss:$16 sps:$4 sm:$0xff]  }
  0xba   :  { %1375 = vmatprep.subr.bf16.mxu0 %v2510_v10  ;;  %1539 = vmatprep.subr.bf16.mxu1 %v2513_v12  ;;  %v1991_v10 = vcombine.low %v2814_v11, %v2814_v11  ;;  %v2600_v12 = vld [vmem:[#allocation5 + $0x600] ss:$16 sps:$4 sm:$0xff]  }
  0xbb   :  { %1405 = vmatprep.mubr.bf16.mxu0 %v1992_v13  ;;  %1569 = vmatprep.mubr.bf16.mxu1 %v1992_v13  ;;  %v2603_v13 = vld [vmem:[#allocation5 + $0x608] ss:$16 sps:$4 sm:$0xff]   ;;  %v2609_v11 = vld [vmem:[#allocation7] sm:$0xff]  }
  0xbd   :  { %1376 = vmatpush1.bf16.msra.mxu0 %v2508_v14  ;;  %1540 = vmatpush1.bf16.msra.mxu1 %v2511_v15  ;;  %v2607_v14 = vld [vmem:[#allocation7 + $0x40] sm:$0xff]  }
  0xbe   :  { %1377 = vmatprep.subr.bf16.mxu0 %v2516_v16  ;;  %1541 = vmatprep.subr.bf16.mxu1 %v2519_v17  ;;  %v2608_v15 = vld [vmem:[#allocation7 + $0xc0] sm:$0xff]   ;;  %v2740_v16 = vmov 0   ;;  %v2606_v17 = vld [vmem:[#allocation2 + $0x18] ss:$0 sps:$4 sm:$0xff]  }
  0xc1   :  { %1378 = vmatpush1.bf16.msra.mxu0 %v2514_v18  ;;  %1542 = vmatpush1.bf16.msra.mxu1 %v2517_v19  ;;  %v2610_v18 = vld [vmem:[#allocation7 + $0x80] sm:$0xff]   ;;  %v2611_v19 = vld [vmem:[#allocation7 + $0x48] sm:$0xff]  }
  0xc2   :  { %1379 = vmatprep.subr.bf16.mxu0 %v2522_v20  ;;  %1543 = vmatprep.subr.bf16.mxu1 %v2525_v21  ;;  %v2612_v20 = vld [vmem:[#allocation7 + $0xc8] sm:$0xff]  }
  0xc3   :  { %v2613_v21 = vld [vmem:[#allocation7 + $0x8] sm:$0xff]  }
  0xc5   :  { %1380 = vmatpush1.bf16.msra.mxu0 %v2520_v22  ;;  %1544 = vmatpush1.bf16.msra.mxu1 %v2523_v23  ;;  %v2614_v22 = vld [vmem:[#allocation7 + $0x88] sm:$0xff]   ;;  %v2615_v23 = vld [vmem:[#allocation7 + $0x50] sm:$0xff]  }
  0xc6   :  { %1381 = vmatprep.subr.bf16.mxu0 %v2528_v24  ;;  %1545 = vmatprep.subr.bf16.mxu1 %v2531_v25  ;;  %v2616_v24 = vld [vmem:[#allocation7 + $0xd0] sm:$0xff]  }
  0xc7   :  { %v2617_v25 = vld [vmem:[#allocation7 + $0x10] sm:$0xff]  }
  0xc9   :  { %1382 = vmatpush1.bf16.msra.mxu0 %v2526_v26  ;;  %1546 = vmatpush1.bf16.msra.mxu1 %v2529_v27  ;;  %v2618_v26 = vld [vmem:[#allocation7 + $0x90] sm:$0xff]   ;;  %v2619_v27 = vld [vmem:[#allocation7 + $0x58] sm:$0xff]  }
  0xca   :  { %1383 = vmatprep.subr.bf16.mxu0 %v2534_v28  ;;  %1547 = vmatprep.subr.bf16.mxu1 %v2537_v29  ;;  %v2620_v28 = vld [vmem:[#allocation7 + $0xd8] sm:$0xff]  }
  0xcb   :  { %v2621_v29 = vld [vmem:[#allocation7 + $0x18] sm:$0xff]  }
  0xcd   :  { %1384 = vmatpush1.bf16.msra.mxu0 %v2532_v30  ;;  %1548 = vmatpush1.bf16.msra.mxu1 %v2535_v31  ;;  %v2622_v30 = vld [vmem:[#allocation7 + $0x98] sm:$0xff]   ;;  %v2623_v31 = vld [vmem:[#allocation7 + $0x60] sm:$0xff]  }
  0xce   :  { %1385 = vmatprep.subr.bf16.mxu0 %v2540_v32  ;;  %1549 = vmatprep.subr.bf16.mxu1 %v2543_v33  ;;  %v2624_v32 = vld [vmem:[#allocation7 + $0xe0] sm:$0xff]  }
  0xcf   :  { %v2625_v33 = vld [vmem:[#allocation7 + $0x20] sm:$0xff]  }
  0xd1   :  { %1386 = vmatpush1.bf16.msra.mxu0 %v2538_v34  ;;  %1550 = vmatpush1.bf16.msra.mxu1 %v2541_v35  ;;  %v2626_v34 = vld [vmem:[#allocation7 + $0xa0] sm:$0xff]   ;;  %v2627_v35 = vld [vmem:[#allocation7 + $0x68] sm:$0xff]  }
  0xd2   :  { %1387 = vmatprep.subr.bf16.mxu0 %v2546_v36  ;;  %1551 = vmatprep.subr.bf16.mxu1 %v2549_v37  ;;  %v2628_v36 = vld [vmem:[#allocation7 + $0xe8] sm:$0xff]  }
  0xd3   :  { %v2629_v37 = vld [vmem:[#allocation7 + $0x28] sm:$0xff]  }
  0xd5   :  { %1388 = vmatpush1.bf16.msra.mxu0 %v2544_v38  ;;  %1552 = vmatpush1.bf16.msra.mxu1 %v2547_v39  ;;  %v2630_v38 = vld [vmem:[#allocation7 + $0xa8] sm:$0xff]   ;;  %v2631_v39 = vld [vmem:[#allocation7 + $0x70] sm:$0xff]  }
  0xd6   :  { %1389 = vmatprep.subr.bf16.mxu0 %v2552_v40  ;;  %1553 = vmatprep.subr.bf16.mxu1 %v2555_v41  ;;  %v2632_v40 = vld [vmem:[#allocation7 + $0xf0] sm:$0xff]  }
  0xd7   :  { %v2633_v41 = vld [vmem:[#allocation7 + $0x30] sm:$0xff]  }
  0xd9   :  { %1390 = vmatpush1.bf16.msra.mxu0 %v2550_v42  ;;  %1554 = vmatpush1.bf16.msra.mxu1 %v2553_v43  ;;  %v2634_v42 = vld [vmem:[#allocation7 + $0xb0] sm:$0xff]   ;;  %v2635_v43 = vld [vmem:[#allocation7 + $0x78] sm:$0xff]  }
  0xda   :  { %1391 = vmatprep.subr.bf16.mxu0 %v2558_v44  ;;  %1555 = vmatprep.subr.bf16.mxu1 %v2561_v45  ;;  %v2636_v44 = vld [vmem:[#allocation7 + $0xf8] sm:$0xff]  }
  0xdb   :  { %v2637_v45 = vld [vmem:[#allocation7 + $0x38] sm:$0xff]  }
  0xdd   :  { %1392 = vmatpush1.bf16.msra.mxu0 %v2556_v46  ;;  %1556 = vmatpush1.bf16.msra.mxu1 %v2559_v47  ;;  %v2638_v46 = vld [vmem:[#allocation7 + $0xb8] sm:$0xff]   ;;  %v263_v47 = vlaneseq }
  0xde   :  { %1393 = vmatprep.subr.bf16.mxu0 %v2564_v48  ;;  %1557 = vmatprep.subr.bf16.mxu1 %v2567_v49 }
  0xdf   :  { %v264_v48 = vshrl.u32 %v263_v47, 7 }
  0xe1   :  { %1394 = vmatpush1.bf16.msra.mxu0 %v2562_v50  ;;  %1558 = vmatpush1.bf16.msra.mxu1 %v2565_v51  ;;  %v265_v49 = vsub.s32 0, %v264_v48  ;;  %v273_v50 = vsub.s32 2, %v264_v48  ;;  %v261_v51 = vld [vmem:[%s2840_s2] sm:$0xf] }
  0xe2   :  { %1395 = vmatprep.subr.bf16.mxu0 %v2570_v52  ;;  %1559 = vmatprep.subr.bf16.mxu1 %v2573_v53  ;;  %v269_v52 = vsub.s32 1, %v264_v48  ;;  %v277_v53 = vsub.s32 3, %v264_v48 }
  0xe5   :  { %1396 = vmatpush1.bf16.msra.mxu0 %v2568_v54  ;;  %1560 = vmatpush1.bf16.msra.mxu1 %v2571_v55  ;;  %v266_v54 = vrot.slane %v261_v51, %v265_v49  ;;  %v274_v55 = vrot.slane %v261_v51, %v273_v50 }
  0xe6   :  { %1397 = vmatprep.subr.bf16.mxu0 %v2576_v56  ;;  %1561 = vmatprep.subr.bf16.mxu1 %v2579_v57  ;;  %v270_v56 = vrot.slane %v261_v51, %v269_v52  ;;  %v278_v57 = vrot.slane %v261_v51, %v277_v53 }
  0xe9   :  { %1398 = vmatpush1.bf16.msra.mxu0 %v2574_v58  ;;  %1562 = vmatpush1.bf16.msra.mxu1 %v2577_v59 }
  0xea   :  { %1399 = vmatprep.subr.bf16.mxu0 %v2582_v60  ;;  %1563 = vmatprep.subr.bf16.mxu1 %v2585_v61 }
  0xed   :  { %1400 = vmatpush1.bf16.msra.mxu0 %v2580_v62  ;;  %1564 = vmatpush1.bf16.msra.mxu1 %v2583_v63 }
  0xee   :  { %1401 = vmatprep.subr.bf16.mxu0 %v2588_v0  ;;  %1565 = vmatprep.subr.bf16.mxu1 %v2591_v1 }
  0xf1   :  { %1402 = vmatpush1.bf16.msra.mxu0 %v2586_v2  ;;  %1566 = vmatpush1.bf16.msra.mxu1 %v2589_v3 }
  0xf2   :  { %1403 = vmatprep.subr.bf16.mxu0 %v2594_v4  ;;  %1567 = vmatprep.subr.bf16.mxu1 %v2597_v5 }
  0xf5   :  { %1404 = vmatpush1.bf16.msra.mxu0 %v2592_v6  ;;  %1568 = vmatpush1.bf16.msra.mxu1 %v2595_v7 }
  0xf6   :  { %1414 = vmatprep.subr.bf16.mxu0 %v2602_v8  ;;  %1578 = vmatprep.subr.bf16.mxu1 %v2605_v9 }
  0xf8   :  { %1406 = vmatmul.mubr.bf16.vlgmr.msra.gmra.mrb[0].mxu0 %v1991_v10  ;;  %1570 = vmatmul.mubr.bf16.vlgmr.msra.gmra.mrb[0].mxu1 %v1991_v10 }
  0xf9   :  { %1415 = vmatpush1.bf16.msra.mxu0 %v2600_v12  ;;  %1579 = vmatpush1.bf16.msra.mxu1 %v2603_v13 }
  0xfa   :  { %1446 = vmatprep.mubr.bf16.mxu0 %v2740_v16  ;;  %1610 = vmatprep.mubr.bf16.mxu1 %v2740_v16 }
  0xfb   :  { %2225 = vmatprep.subr.bf16.mxu0 %v2607_v14  ;;  %2247 = vmatprep.subr.bf16.mxu1 %v2608_v15 }
 0x104   :  { %2190 = vmatmul.mubr.msk.bf16.vlgmr.msra.gmra.mrb[0].mxu0 %vm1287_vm0, %v2606_v17  ;;  %2191 = vmatmul.mubr.msk.bf16.vlgmr.msra.gmra.mrb[0].mxu1 %vm1287_vm0, %v2606_v17  ;;  %v2192_v17 = vld [vmem:[%s2842_s4] ss:$0 sm:$0xff] }
 0x105   :  { %2226 = vmatpush3.bf16.msra.mxu0 %v2609_v11  ;;  %2248 = vmatpush3.bf16.msra.mxu1 %v2610_v18 }
 0x106   :  { %2227 = vmatprep.subr.bf16.mxu0 %v2611_v19  ;;  %2249 = vmatprep.subr.bf16.mxu1 %v2612_v20 }
 0x109   :  { %2228 = vmatpush3.bf16.msra.mxu0 %v2613_v21  ;;  %2250 = vmatpush3.bf16.msra.mxu1 %v2614_v22 }
 0x10a   :  { %2229 = vmatprep.subr.bf16.mxu0 %v2615_v23  ;;  %2251 = vmatprep.subr.bf16.mxu1 %v2616_v24 }
 0x10d   :  { %2230 = vmatpush3.bf16.msra.mxu0 %v2617_v25  ;;  %2252 = vmatpush3.bf16.msra.mxu1 %v2618_v26 }
 0x10e   :  { %2231 = vmatprep.subr.bf16.mxu0 %v2619_v27  ;;  %2253 = vmatprep.subr.bf16.mxu1 %v2620_v28 }
 0x111   :  { %2232 = vmatpush3.bf16.msra.mxu0 %v2621_v29  ;;  %2254 = vmatpush3.bf16.msra.mxu1 %v2622_v30 }
 0x112   :  { %2233 = vmatprep.subr.bf16.mxu0 %v2623_v31  ;;  %2255 = vmatprep.subr.bf16.mxu1 %v2624_v32 }
 0x115   :  { %2234 = vmatpush3.bf16.msra.mxu0 %v2625_v33  ;;  %2256 = vmatpush3.bf16.msra.mxu1 %v2626_v34 }
 0x116   :  { %2235 = vmatprep.subr.bf16.mxu0 %v2627_v35  ;;  %2257 = vmatprep.subr.bf16.mxu1 %v2628_v36 }
 0x119   :  { %2236 = vmatpush3.bf16.msra.mxu0 %v2629_v37  ;;  %2258 = vmatpush3.bf16.msra.mxu1 %v2630_v38 }
 0x11a   :  { %2237 = vmatprep.subr.bf16.mxu0 %v2631_v39  ;;  %2259 = vmatprep.subr.bf16.mxu1 %v2632_v40 }
 0x11d   :  { %2238 = vmatpush3.bf16.msra.mxu0 %v2633_v41  ;;  %2260 = vmatpush3.bf16.msra.mxu1 %v2634_v42 }
 0x11e   :  { %2239 = vmatprep.subr.bf16.mxu0 %v2635_v43  ;;  %2261 = vmatprep.subr.bf16.mxu1 %v2636_v44 }
 0x121   :  { %2240 = vmatpush3.bf16.msra.mxu0 %v2637_v45  ;;  %2262 = vmatpush3.bf16.msra.mxu1 %v2638_v46 }
 0x1d7   :  { %v1448_v58 = vpop.f32.mrb[0].mxu0  ;;  %v1612_v59 = vpop.f32.mrb[0].mxu1 }
 0x1d8   :  { %v2269_v60 = vadd.f32 %v1448_v58, %v266_v54  ;;  %v2271_v61 = vadd.f32 %v1612_v59, %v274_v55  ;;  %v1450_v62 = vpop.f32.mrb[1].mxu0  ;;  %v1614_v63 = vpop.f32.mrb[1].mxu1 }
 0x1d9   :  { %v2270_v0 = vadd.f32 %v1450_v62, %v270_v56  ;;  %v2272_v1 = vadd.f32 %v1614_v63, %v278_v57  ;;  %v1452_v2 = vpop.f32.mrb[2].mxu0  ;;  %v1616_v3 = vpop.f32.mrb[2].mxu1 }
 0x1da   :  { %v1619_v4 = vmax.f32 %v2269_v60, 0.0  ;;  %v1621_v5 = vmax.f32 %v2271_v61, 0.0  ;;  %v1453_v6 = vpop.f32.mrb[3].mxu0  ;;  %v1617_v7 = vpop.f32.mrb[3].mxu1 }
 0x1db   :  { %v1620_v8 = vmax.f32 %v2270_v0, 0.0  ;;  %v1622_v9 = vmax.f32 %v2272_v1, 0.0 }
 0x1dc   :  { %v1623_v13 = vpack.c.bf16 %v1619_v4, %v1619_v4  ;;  %v1625_v14 = vpack.c.bf16 %v1621_v5, %v1621_v5 }
 0x1dd   :  { %v1624_v10 = vpack.c.bf16 %v1620_v8, %v1620_v8  ;;  %v1626_v12 = vpack.c.bf16 %v1622_v9, %v1622_v9 }
 0x1df   :  { %1922 = vmatprep.mubr.bf16.mxu0 %v1624_v10  ;;  %1962 = vmatprep.mubr.bf16.mxu1 %v1626_v12 }
 0x1e0   :  { %1923 = vmatmul.mubr.bf16.vlgmr.msra.gmra.mrb[4].mxu0 %v1623_v13  ;;  %1963 = vmatmul.mubr.bf16.vlgmr.msra.gmra.mrb[4].mxu1 %v1625_v14 }
 0x2b3   :  { %v2241_v15 = vpop.f32.mrb[4].mxu0  ;;  %v2263_v16 = vpop.f32.mrb[4].mxu1 }
 0x2b4   :  { %v2242_v11 = vpop.f32.mrb[5].mxu0  ;;  %v2264_v18 = vpop.f32.mrb[5].mxu1 }
 0x2b5   :  { %v2243_v19 = vadd.f32 %v2242_v11, %v2241_v15  ;;  %v2265_v20 = vadd.f32 %v2264_v18, %v2263_v16  ;;  %v2244_v21 = vpop.f32.mrb[6].mxu0  ;;  %v2266_v22 = vpop.f32.mrb[6].mxu1 }
 0x2b6   :  { %v2245_v23 = vpop.f32.mrb[7].mxu0  ;;  %v2267_v24 = vpop.f32.mrb[7].mxu1 }
 0x2b7   :  { %v1925_v25 = vadd.f32 %v2243_v19, %v2192_v17 }
 0x2b9   :  { %v1965_v26 = vadd.f32 %v2265_v20, %v1925_v25 }
 0x2bb   :  { %1970 = vst [vmem:[#allocation8] sm:$0xff] %v1965_v26 }
 0x2bc   :  { %2716 = shalt.err (!%p2713_p0)
}
 0x2bd   :  { %s2717_s12 = scalar_lea.hbm %s2843_s5, 128 }
 0x2be   :  { %p2718_p1 = scmp.ne.s32.totalorder %s2843_s5, %s2717_s12  ;;  %p2721_p2 = scmp.lt.u32.totalorder %s2717_s12, %s2843_s5 }
 0x2c0   :  { %p2723_p3 = pnand %p2721_p2, %p2718_p1 }
 0x2c2   :  { %2726 = shalt.err (!%p2723_p3)
}
 0x2c3   :  { %1980 = dma.vmem_to_hbm [thread:$0]  %s1978_s9, 128, %s2843_s5, [#allocation4]  }
 0x2c4   :  { %2731 = dma.done.wait [#allocation4], 128  }
 0x2c5   :  { %2732 = vsyncadd [#allocation4], 4294967168 }
 0x2c6   :  { %1984 = vsyncpa [#allocation3], 1 }
 0x2c7   :  { %1985 = vsyncpa [#allocation6], 1 }
 0x2c8   :  { %1986 = vsyncpa [#allocation4], 1 }

</bundles_post_ra>
